<compile_context>
chip_gen: v5e
topology: v5e:2x2
jax: 0.10.0
libtpu: 0.0.40
codegen_flags: <defaults>
</compile_context>

<pallas_src>
import math

import jax
import jax.numpy as jnp
from jax import lax
from jax.experimental import pallas as pl
from jax.experimental.pallas import tpu as pltpu


# ---------------------------------------------------------------------------
# Kernel 1: fused QKV projection (one lane-dense (E, 3*hidden) matmul per row tile).
# ---------------------------------------------------------------------------
def _qkv_proj_kernel(x_ref, w_ref, b_ref, qkv_ref):
    # x_ref: (1, tr, E) bf16 ; w_ref: (E, 3*hidden) bf16 ; b_ref: (1, 3*hidden) f32
    x = x_ref[0]
    acc = jnp.dot(x, w_ref[...], preferred_element_type=jnp.float32) + b_ref[...]
    qkv_ref[0] = acc.astype(qkv_ref.dtype)


# ---------------------------------------------------------------------------
# Kernel 2: per-head attention + single full-depth output projection.
# ---------------------------------------------------------------------------
def _make_attn_kernel(n_heads, d_head, is_decoder, use_mask):
    neg_big = -100000.0

    def kernel(q_ref, k_ref, v_ref, mcol_ref, mrow_ref, wo_ref, bo_ref,
               out_ref, ctx_ref):
        tq = q_ref.shape[2]
        S = k_ref.shape[2]

        # ---- coupling / causal bias: computed once per step, shared by all heads ----
        bias = None
        if use_mask:
            m_col = mcol_ref[0].astype(jnp.float32)          # (tq, 1) — pre-shaped
            m_row = mrow_ref[0].astype(jnp.float32)          # (1,  S)
            att = m_col * m_row                              # (tq, S)
            pad = (1.0 - m_col) * (1.0 - m_row)              # (tq, S)
            if is_decoder:
                qi = pl.program_id(1)
                row = lax.broadcasted_iota(jnp.int32, (tq, S), 0) + qi * tq
                col = lax.broadcasted_iota(jnp.int32, (tq, S), 1)
                att = att * (row >= col).astype(jnp.float32)
            bias = (1.0 - att - pad) * neg_big               # (tq, S) f32

        # ---- per-head attention; head-major leading-axis indexing (no lane slices) ----
        for h in range(n_heads):
            qh = q_ref[0, h]        # (tq, d_head) bf16 (1/sqrt(d) folded into Wq)
            kh = k_ref[0, h]        # (S,  d_head) bf16
            vh = v_ref[0, h]        # (S,  d_head) bf16

            # contract the shared minor dim -> (tq, S); no explicit k transpose
            s = lax.dot_general(qh, kh,
                                dimension_numbers=(((1,), (1,)), ((), ())),
                                preferred_element_type=jnp.float32)
            if bias is not None:
                s = s + bias

            # numerically-stable softmax stats in f32
            s = s - jnp.max(s, axis=-1, keepdims=True)
            p = jnp.exp(s)
            row_sum = jnp.sum(p, axis=-1, keepdims=True)

            # normalize after the PV matmul (tq*d_head mults instead of tq*S)
            pv = jnp.dot(p.astype(jnp.bfloat16), vh,
                         preferred_element_type=jnp.float32)        # (tq, d_head)
            head_out = pv * pl.reciprocal(row_sum, approx=True)

            lo = h * d_head
            ctx_ref[:, lo:lo + d_head] = head_out.astype(jnp.bfloat16)

        # ---- one K=hidden output projection (full MXU contraction depth) ----
        out = (jnp.dot(ctx_ref[...], wo_ref[...],
                       preferred_element_type=jnp.float32) + bo_ref[...])
        out_ref[0] = out.astype(out_ref.dtype)

    return kernel


# ---------------------------------------------------------------------------
# Wrapper
# ---------------------------------------------------------------------------
def multi_head_attention(hidden_state, attention_masks, params, *,
                         n_heads, is_decoder):
    """hidden_state: [B, S, E] f32; attention_masks: [B, S] float 0/1 or None."""
    B, S, E = hidden_state.shape
    wq, bq, wk, bk, wv, bv, wo, bo = params
    H, _, d_head = wq.shape
    hidden = H * d_head
    assert H == n_heads

    use_mask = attention_masks is not None
    mask = (jnp.ones((B, S), jnp.float32) if attention_masks is None
            else attention_masks.astype(jnp.float32))
    mask_col = mask[:, :, None]          # (B, S, 1) — avoids in-kernel relayout
    mask_row = mask[:, None, :]          # (B, 1, S)

    scale = 1.0 / math.sqrt(d_head)

    def fuse(w):  # (H, E, d_head) -> (E, H*d_head), head-major columns (= torch.cat order)
        return jnp.transpose(w, (1, 0, 2)).reshape(E, hidden)

    # Fold the 1/sqrt(d_head) scale into the Q projection (softmax-invariant).
    w_qkv = jnp.concatenate([fuse(wq) * scale, fuse(wk), fuse(wv)],
                            axis=1).astype(jnp.bfloat16)                 # (E, 3*hidden)
    b_qkv = jnp.concatenate([bq.reshape(-1) * scale, bk.reshape(-1),
                             bv.reshape(-1)]).reshape(1, 3 * hidden).astype(jnp.float32)

    x_b = hidden_state.astype(jnp.bfloat16)

    # ---- pass 1: fused QKV projection (computed once, NOT per query tile) ----
    tr = S if S <= 256 else 256
    assert S % tr == 0, "sequence length must be a multiple of the projection row tile"
    qkv = pl.pallas_call(
        _qkv_proj_kernel,
        out_shape=jax.ShapeDtypeStruct((B, S, 3 * hidden), jnp.bfloat16),
        grid_spec=pltpu.PrefetchScalarGridSpec(
            num_scalar_prefetch=0,
            grid=(B, S // tr),
            in_specs=[
                pl.BlockSpec((1, tr, E), lambda b, r: (b, r, 0)),          # x rows
                pl.BlockSpec((E, 3 * hidden), lambda b, r: (0, 0)),        # W_qkv fused
                pl.BlockSpec((1, 3 * hidden), lambda b, r: (0, 0)),        # b_qkv fused
            ],
            out_specs=pl.BlockSpec((1, tr, 3 * hidden), lambda b, r: (b, r, 0)),
        ),
        compiler_params=pltpu.CompilerParams(
            dimension_semantics=("parallel", "parallel"),
            vmem_limit_bytes=40 * 1024 * 1024),
    )(x_b, w_qkv, b_qkv)

    # Head-major layout plumbing (wrapper-side, done once) so the attention kernel
    # indexes heads along a leading axis with d_head as the full last dim.
    def split_heads(a):  # (B, S, hidden) -> (B, H, S, d_head)
        return jnp.transpose(a.reshape(B, S, H, d_head), (0, 2, 1, 3))

    q_hm = split_heads(qkv[..., :hidden])
    k_hm = split_heads(qkv[..., hidden:2 * hidden])
    v_hm = split_heads(qkv[..., 2 * hidden:])

    # ---- pass 2: attention + output projection, tiled over query rows ----
    tq = S if S <= 128 else 128
    assert S % tq == 0, "sequence length must be a multiple of the query tile"
    nq = S // tq

    kernel = _make_attn_kernel(n_heads, d_head, is_decoder, use_mask)

    return pl.pallas_call(
        kernel,
        out_shape=jax.ShapeDtypeStruct((B, S, hidden), jnp.float32),
        grid_spec=pltpu.PrefetchScalarGridSpec(
            num_scalar_prefetch=0,
            grid=(B, nq),
            in_specs=[
                pl.BlockSpec((1, H, tq, d_head), lambda b, q: (b, 0, q, 0)),  # Q (head-major)
                pl.BlockSpec((1, H, S, d_head), lambda b, q: (b, 0, 0, 0)),   # K (resident across q)
                pl.BlockSpec((1, H, S, d_head), lambda b, q: (b, 0, 0, 0)),   # V (resident across q)
                pl.BlockSpec((1, tq, 1), lambda b, q: (b, q, 0)),             # mask column (query rows)
                pl.BlockSpec((1, 1, S), lambda b, q: (b, 0, 0)),              # mask row (key cols)
                pl.BlockSpec((hidden, hidden), lambda b, q: (0, 0)),          # Wo
                pl.BlockSpec((1, hidden), lambda b, q: (0, 0)),               # bo
            ],
            out_specs=pl.BlockSpec((1, tq, hidden), lambda b, q: (b, q, 0)),
            scratch_shapes=[pltpu.VMEM((tq, hidden), jnp.bfloat16)],          # head-context slab
        ),
        compiler_params=pltpu.CompilerParams(
            dimension_semantics=("parallel", "parallel"),
            vmem_limit_bytes=40 * 1024 * 1024),
    )(q_hm, k_hm, v_hm, mask_col, mask_row,
      wo.astype(jnp.bfloat16), bo.reshape(1, hidden).astype(jnp.float32))


# ---------------------------------------------------------------------------
# Pure-JAX f32 reference mirroring the PyTorch module exactly.
# ---------------------------------------------------------------------------
def _reference(hidden_state, attention_masks, params, *, n_heads, is_decoder):
    wq, bq, wk, bk, wv, bv, wo, bo = params
    H, E, d_head = wq.shape
    x = hidden_state
    outs = []
    for h in range(H):
        q = x @ wq[h] + bq[h]
        k = x @ wk[h] + bk[h]
        v = x @ wv[h] + bv[h]
        score = jnp.einsum("bsd,btd->bst", q, k) / math.sqrt(d_head)
        if attention_masks is not None:
            m = attention_masks.astype(jnp.float32)
            att = m[:, :, None] * m[:, None, :]
            pad = (1 - m)[:, :, None] * (1 - m)[:, None, :]
            if is_decoder:
                att = jnp.tril(att)
            coupling = 1 - att - pad
            score = score + coupling * -100000.0
        w = jax.nn.softmax(score, axis=-1)
        outs.append(jnp.einsum("bst,btd->bsd", w, v))
    cat = jnp.concatenate(outs, axis=-1)
    return cat @ wo + bo


def init_params(key, emb_dim, hidden_dim, n_heads):
    d_head = hidden_dim // n_heads
    keys = jax.random.split(key, 8)
    wq = 0.05 * jax.random.normal(keys[0], (n_heads, emb_dim, d_head), jnp.float32)
    bq = 0.05 * jax.random.normal(keys[1], (n_heads, d_head), jnp.float32)
    wk = 0.05 * jax.random.normal(keys[2], (n_heads, emb_dim, d_head), jnp.float32)
    bk = 0.05 * jax.random.normal(keys[3], (n_heads, d_head), jnp.float32)
    wv = 0.05 * jax.random.normal(keys[4], (n_heads, emb_dim, d_head), jnp.float32)
    bv = 0.05 * jax.random.normal(keys[5], (n_heads, d_head), jnp.float32)
    wo = 0.05 * jax.random.normal(keys[6], (hidden_dim, hidden_dim), jnp.float32)
    bo = 0.05 * jax.random.normal(keys[7], (hidden_dim,), jnp.float32)
    return (wq, bq, wk, bk, wv, bv, wo, bo)


if __name__ == "__main__":
    B, S = 2, 8
    emb_dim, hidden_dim, n_heads = 32, 128, 4   # hidden_dim=128 -> lane-dense output
    is_decoder = True

    key = jax.random.PRNGKey(0)
    k_x, k_p = jax.random.split(key)

    hidden_state = jax.random.normal(k_x, (B, S, emb_dim), jnp.float32)
    # padding mask: batch 0 fully valid, batch 1 has last 3 positions padded
    attention_masks = jnp.array(
        [[1] * S,
         [1] * (S - 3) + [0] * 3], dtype=jnp.float32)

    params = init_params(k_p, emb_dim, hidden_dim, n_heads)

    out = multi_head_attention(hidden_state, attention_masks, params,
                               n_heads=n_heads, is_decoder=is_decoder)
    out = jax.block_until_ready(out)

    ref = _reference(hidden_state, attention_masks, params,
                     n_heads=n_heads, is_decoder=is_decoder)

    assert out.shape == (B, S, hidden_dim)
    # bf16 MXU operands (f32 accumulation / softmax stats) -> loosened tolerance
    assert jnp.allclose(out, ref, atol=2e-2, rtol=2e-2), \
        f"mismatch vs reference, max abs err {jnp.max(jnp.abs(out - ref))}"
    print("KERNEL_OK")
</pallas_src>

<mosaic_0001>
module attributes {stable_mosaic.version = 11 : i64} {
  func.func @_qkv_proj_kernel(%arg0: i32, %arg1: i32, %arg2: memref<1x8x32xbf16, #tpu.memory_space<vmem>>, %arg3: memref<32x384xbf16, #tpu.memory_space<vmem>>, %arg4: memref<1x384xf32, #tpu.memory_space<vmem>>, %arg5: memref<1x8x384xbf16, #tpu.memory_space<vmem>>) attributes {dimension_semantics = [#tpu.dimension_semantics<parallel>, #tpu.dimension_semantics<parallel>], iteration_bounds = array<i64: 2, 1>, scalar_prefetch = 0 : i64, scratch_operands = 0 : i64, tpu.core_type = #tpu.core_type<tc>, window_params = [{transform_indices = @transform_0, window_bounds = array<i64: 1, 8, 32>}, {pipeline_mode = #tpu.pipeline_mode<synchronous>, transform_indices = @transform_1, window_bounds = array<i64: 32, 384>}, {pipeline_mode = #tpu.pipeline_mode<synchronous>, transform_indices = @transform_2, window_bounds = array<i64: 1, 384>}, {transform_indices = @transform_3, window_bounds = array<i64: 1, 8, 384>}]} {
    %c0 = arith.constant 0 : index
    %c0_0 = arith.constant 0 : index
    %c0_1 = arith.constant 0 : index
    %0 = vector.load %arg2[%c0, %c0_0, %c0_1] : memref<1x8x32xbf16, #tpu.memory_space<vmem>>, vector<1x8x32xbf16>
    %1 = vector.shape_cast %0 : vector<1x8x32xbf16> to vector<8x32xbf16>
    %c0_2 = arith.constant 0 : index
    %c0_3 = arith.constant 0 : index
    %2 = vector.load %arg3[%c0_2, %c0_3] : memref<32x384xbf16, #tpu.memory_space<vmem>>, vector<32x384xbf16>
    %cst = arith.constant dense<0.000000e+00> : vector<8x384xf32>
    %3 = tpu.matmul %1, %2, %cst {dimension_numbers = #tpu.dot_dimension_numbers<[1], [0], [0], [1], [0, 0, 1, 1], [], []>} : vector<8x32xbf16>, vector<32x384xbf16>, vector<8x384xf32> -> vector<8x384xf32>
    %c0_4 = arith.constant 0 : index
    %c0_5 = arith.constant 0 : index
    %4 = vector.load %arg4[%c0_4, %c0_5] : memref<1x384xf32, #tpu.memory_space<vmem>>, vector<1x384xf32>
    %5 = vector.broadcast %4 : vector<1x384xf32> to vector<8x384xf32>
    %6 = arith.addf %3, %5 : vector<8x384xf32>
    %7 = arith.truncf %6 : vector<8x384xf32> to vector<8x384xbf16>
    %c0_6 = arith.constant 0 : index
    %c0_7 = arith.constant 0 : index
    %c0_8 = arith.constant 0 : index
    %8 = vector.load %arg5[%c0_6, %c0_7, %c0_8] : memref<1x8x384xbf16, #tpu.memory_space<vmem>>, vector<1x8x384xbf16>
    %9 = vector.shape_cast %8 : vector<1x8x384xbf16> to vector<8x384xbf16>
    %10 = vector.shape_cast %7 : vector<8x384xbf16> to vector<1x8x384xbf16>
    tpu.vector_store %arg5[%c0_6, %c0_7, %c0_8], %10 {strides = array<i32>} : memref<1x8x384xbf16, #tpu.memory_space<vmem>>, vector<1x8x384xbf16>,
    return
  }
  func.func @transform_0(%arg0: i32, %arg1: i32) -> (i32, i32, i32) {
    %c0_i32 = arith.constant 0 : i32
    %c0_i32_0 = arith.constant 0 : i32
    return %arg0, %arg1, %c0_i32 : i32, i32, i32
  }
  func.func @transform_1(%arg0: i32, %arg1: i32) -> (i32, i32) {
    %c0_i32 = arith.constant 0 : i32
    %c0_i32_0 = arith.constant 0 : i32
    %c0_i32_1 = arith.constant 0 : i32
    return %c0_i32, %c0_i32_0 : i32, i32
  }
  func.func @transform_2(%arg0: i32, %arg1: i32) -> (i32, i32) {
    %c0_i32 = arith.constant 0 : i32
    %c0_i32_0 = arith.constant 0 : i32
    %c0_i32_1 = arith.constant 0 : i32
    return %c0_i32, %c0_i32_0 : i32, i32
  }
  func.func @transform_3(%arg0: i32, %arg1: i32) -> (i32, i32, i32) {
    %c0_i32 = arith.constant 0 : i32
    %c0_i32_0 = arith.constant 0 : i32
    return %arg0, %arg1, %c0_i32 : i32, i32, i32
  }
}

</mosaic_0001>

<bundles_post_ra>
// kernel: tpu_custom_call.1
= control target key start
LH: loop header
LB: loop body
LE: loop exit
PB: predicated region body
PF: predicated region fallthrough
CT: control target
= control target key end

     0   :  { %8 = vsyncpa [#allocation3], 0  ;;  %s935_s0 = inlined_call_operand.hbm [shape: bf16[2,8,32], index: 0, kind: input, shape index: {}]   ;;  %s936_s1 = inlined_call_operand.hbm [shape: bf16[32,384], index: 1, kind: input, shape index: {}]   ;;  %s937_s2 = inlined_call_operand.hbm [shape: f32[1,384], index: 2, kind: input, shape index: {}]   ;;  %s938_s3 = inlined_call_operand.hbm [shape: bf16[2,8,384], index: 3, kind: output, shape index: {}]  }
   0x1   :  { %10 = vsyncpa [#allocation3 + $0x1], 0 }
   0x2   :  { %11 = vsyncpa [#allocation6], 0 }
   0x3   :  { %12 = vsyncpa [#allocation4], 0 }
   0x4   :  { %14 = vsyncpa [#allocation4 + $0x1], 0  ;;  %s790_s12 = smov 0   ;;  %s792_s13 = smov 0  }
   0x5   :  { %s794_s14 = smov 0   ;;  %s796_s15 = smov 0  }
   0x6   :  { %s798_s16 = smov 0   ;;  %s800_s17 = smov 0  }
   0x7 LB: > { %s453_s18 = sadd.s32 4294967295, %s764_s17   ;;  %p455_p0 = scmp.ge.s32.totalorder %s764_s17, 1  ;;  %s764_s17 = sphi %s800_s17, %s20_s17   ;;  %s760_s16 = sphi %s798_s16, %s948_s16   ;;  %s756_s15 = sphi %s796_s15, %s947_s15   ;;  %s752_s14 = sphi %s794_s14, %s946_s14   ;;  %s748_s13 = sphi %s792_s13, %s945_s13   ;;  %s744_s12 = sphi %s790_s12, %s944_s12  }
   0x8   : > { %p824_p1 = scmp.eq.s32.totalorder %s453_s18, 0  ;;  %p135_p2 = scmp.lt.s32.totalorder %s764_s17, 3 }
   0x9   : > { %s146_s22 = sshll.u32 %s936_s1, 4  ;;  %s766_s24 = smov [#allocation5]   ;;  %s147_s22 = int_to_ptr.hbm [resolvable:$true] %s146_s22 }
   0xa   : > { %p832_p3 = pnand %p455_p0, %p135_p2  ;;  %s148_s25 = sshll.u32 %s766_s24, 4  ;;  %s149_s25 = int_to_ptr.vmem [resolvable:$true] %s148_s25 }
   0xb   : > { %p458_p6 = scmp.ge.s32.totalorder %s764_s17, 2  ;;  %s161_s28 = sshll.u32 %s937_s2, 4  ;;  %s162_s28 = int_to_ptr.hbm [resolvable:$true] %s161_s28 }
   0xc   : > { %p515_p4 = pneg %p832_p3  ;;  %s767_s29 = smov 192  }
   0xd   : > { %s768_s30 = smov 12   ;;  %s769_s4 = smov [#allocation7]  }
   0xe   : > { %p516_p5 = pnand %p515_p4, %p824_p1  ;;  %s163_s5 = sshll.u32 %s769_s4, 4  ;;  %s164_s5 = int_to_ptr.vmem [resolvable:$true] %s163_s5 }
   0xf   : > { %s32_s6 = sadd.s32 1, %s760_s16  ;;  %s454_s7 = sadd.s32 4294967294, %s764_s17  }
  0x10   : > { %518 = dma.hbm_to_vmem [thread:$0]  (!%p516_p5), %s147_s22, 768, %s149_s25, [#allocation6], %s767_s29, %s767_s29, %s768_s30  }
  0x11   : > { %521 = dma.hbm_to_vmem [thread:$0]  (!%p516_p5), %s162_s28, 48, %s164_s5, [#allocation6]  }
  0x12   : > { %p34_p7 = scmp.ge.s32.totalorder %s32_s6, 2  ;;  %s41_s8 = sadd.s32 1, %s752_s14 }
  0x13   : > { %p48_p8 = scmp.ne.s32.totalorder %s752_s14, %s748_s13  ;;  %p49_p9 = scmp.eq.s32.totalorder %s764_s17, 0 }
  0x14   : > { %s950_s6 = smov (%p34_p7, %s32_s6), 0  ;;  %p54_p10 = scmp.ne.s32.totalorder %s748_s13, %s744_s12 }
  0x15   : > { %s36_s9 = ssub.s32 %s760_s16, %s950_s6  ;;  %p122_p11 = scmp.eq.s32.totalorder %s453_s18, 1 }
  0x16   : > { %p39_p12 = scmp.eq.s32.totalorder %s36_s9, 0  ;;  %p860_p13 = por %p824_p1, %p54_p10 }
  0x17   : > { %p864_p0 = por %p122_p11, %p48_p8  ;;  %p128_p2 = scmp.eq.s32.totalorder %s454_s7, 1 }
  0x18   : > { %s869_s20 = scalar_select %p39_p12, %s752_s14, %s41_s8  }
  0x19   : > { %p50_p4 = por %p49_p9, %p48_p8  ;;  %p871_p5 = por %p128_p2, %p54_p10 }
  0x1a   : > { %s174_s22 = sand.u32 1, %s752_s14   ;;  %s460_s18 = sshll.u32 %s760_s16, 2 }
  0x1b   : > { %p532_p7 = scmp.lt.s32.totalorder %s764_s17, 2  ;;  %s459_s24 = sshll.u32 %s174_s22, 2 }
  0x1c   : > { %s183_s27 = scalar_lea.hbm %s935_s0, %s460_s18  ;;  %s178_s29 = scalar_lea.vmem [#allocation2], %s459_s24 }
  0x1d   : > { %s185_s28 = sshll.u32 %s183_s27, 4  ;;  %s187_s30 = sshll.u32 %s178_s29, 4  ;;  %s186_s28 = int_to_ptr.hbm [resolvable:$true] %s185_s28  ;;  %s188_s30 = int_to_ptr.vmem [resolvable:$true] %s187_s30 }
  0x1e   : > { %p523_p11 = pnand %p532_p7, %p50_p4  ;;  %s175_s4 = scalar_lea.sflag [#allocation3], %s174_s22 }
  0x1f   : > { %196 = sbr.rel (%p832_p3) target bundleno = 191 (0xbf), region = 32  ;;  %s884_s5 = sand.u32 (!%p832_p3), 1, %s748_s13  }
  0x20   : > { %525 = dma.hbm_to_vmem [thread:$0]  (!%p523_p11), %s186_s28, 64, %s188_s30, %s175_s4  }
  0x21   : > { %s462_s7 = sshll.u32 (!%p832_p3), %s884_s5, 2  ;;  %s199_s8 = scalar_lea.sflag (!%p832_p3), [#allocation3], %s884_s5 }
  0x22   : > { %s202_s9 = scalar_lea.vmem (!%p832_p3), [#allocation2], %s462_s7 }
  0x24   : > { %731 = dma.done.wait (%p860_p13), %s199_s8, 64  }
  0x25   : > { %733 = vsyncadd (%p860_p13), %s199_s8, 4294967232 }
  0x26   : > { %735 = dma.done.wait (%p824_p1), [#allocation6], 816  }
  0x27   : > { %737 = vsyncadd (%p824_p1), [#allocation6], 4294966480  ;;  %v479_v0 = vld [vmem:[#allocation5 + $0x18] sm:$0xf]  ;;  %v499_v1 = vld [vmem:[#allocation5 + $0x20] sm:$0xf0] }
  0x28   : > { %v498_v2 = vld [vmem:[#allocation5 + $0x1c] sm:$0xf]  ;;  %v480_v3 = vor.u32 %v499_v1, %v479_v0  ;;  %v481_v4 = vld [vmem:[#allocation5 + $0x24] sm:$0xf0]  ;;  %v487_v5 = vld [vmem:[#allocation5 + $0x20] sm:$0xf] }
  0x29   : > { %v500_v6 = vld [vmem:[#allocation5 + $0x28] sm:$0xf0]  ;;  %v484_v7 = vor.u32 %v498_v2, %v481_v4  ;;  %v467_v9 = vld [vmem:[#allocation5] sm:$0xf]  ;;  %v495_v11 = vld [vmem:[#allocation5 + $0x4] sm:$0xf] }
  0x2a   : > { %v488_v8 = vor.u32 %v500_v6, %v487_v5  ;;  %v496_v10 = vld [vmem:[#allocation5 + $0x8] sm:$0xf0]  ;;  %296 = vmatpush.bf16.msra.mxu0 %v480_v3  ;;  %v469_v13 = vld [vmem:[#allocation5 + $0xc] sm:$0xf0]  ;;  %v475_v14 = vld [vmem:[#allocation5 + $0x8] sm:$0xf] }
  0x2b   : > { %v468_v12 = vor.u32 %v496_v10, %v467_v9  ;;  %v497_v15 = vld [vmem:[#allocation5 + $0x10] sm:$0xf0]  ;;  %309 = vmatpush.bf16.msra.mxu1 %v484_v7  ;;  %v472_v16 = vor.u32 %v495_v11, %v469_v13  ;;  %v237_v18 = vld [vmem:[%s202_s9] sm:$0xf]  ;;  %vm286_vm0 = vcmask 261120   ;;  %s501_s19 = smul.u32 12, %s884_s5 }
  0x2c   : > { %322 = vmatpush.bf16.msra.mxu2 %v488_v8  ;;  %v476_v17 = vor.u32 %v497_v15, %v475_v14  ;;  %v246_v19 = vld [vmem:[#allocation7] sm:$0x7]  ;;  %s502_s23 = smul.u32 12, %s756_s15  ;;  %s334_s15 = scalar_lea.sflag [#allocation4], %s884_s5 }
  0x2d   : > { %v248_v20 = vperm.slane %v246_v19, 0  ;;  %v249_v21 = vperm.slane %v246_v19, 1  ;;  %v250_v27 = vperm.slane %v246_v19, 2  ;;  %s235_s24 = scalar_lea.vmem [#allocation8], %s501_s19  ;;  %s698_s4 = scalar_lea.hbm %s938_s3, 24 }
  0x2e   : > { %297 = vmatpush.bf16.msra.mxu0 %v468_v12  ;;  %s347_s18 = scalar_lea.hbm %s938_s3, %s502_s23  ;;  %s349_s25 = sshll.u32 %s235_s24, 4  ;;  %s350_s25 = int_to_ptr.vmem [resolvable:$true] %s349_s25 }
  0x2f   : > { %310 = vmatpush.bf16.msra.mxu1 %v472_v16  ;;  %s351_s26 = sshll.u32 %s347_s18, 4  ;;  %s352_s26 = int_to_ptr.hbm [resolvable:$true] %s351_s26 }
  0x30   : > { %323 = vmatpush.bf16.msra.mxu2 %v476_v17  ;;  %s692_s27 = sshra.s32 %s352_s26, 4  ;;  %s693_s27 = int_to_ptr.hbm [resolvable:$true] %s692_s27 }
  0x31   : > { %489 = vmatmul.msk.bf16.vlgmr.msra.gmra.mxu0 %vm286_vm0, %v237_v18  ;;  %s694_s28 = scalar_lea.hbm %s693_s27, 12  ;;  %p699_p9 = scmp.lt.s32.totalorder %s693_s27, %s938_s3 }
  0x32   : > { %490 = vmatmul.msk.bf16.vlgmr.msra.gmra.mxu1 %vm286_vm0, %v237_v18  ;;  %p695_p1 = scmp.ne.s32.totalorder %s693_s27, %s694_s28  ;;  %p700_p10 = scmp.lt.s32.totalorder %s698_s4, %s694_s28 }
  0x33   : > { %491 = vmatmul.msk.bf16.vlgmr.msra.gmra.mxu2 %vm286_vm0, %v237_v18 }
  0x34   : > { %p696_p3 = pnand %p695_p1, %p864_p0  ;;  %p701_p12 = por %p700_p10, %p699_p9 }
  0x36   : > { %p697_p8 = pneg %p696_p3 }
  0x38   : > { %p702_p13 = pnand %p701_p12, %p697_p8 }
  0xae   : > { %v299_v22 = vpop.f32.mrf.mxu0 }
  0xaf   : > { %v300_v23 = vadd.f32 %v299_v22, %v248_v20  ;;  %v312_v24 = vpop.f32.mrf.mxu1 }
  0xb0   : > { %v313_v25 = vadd.f32 %v312_v24, %v249_v21 }
  0xb2   : > { %v329_v26 = vpack.c.bf16 %v313_v25, %v300_v23 }
  0xb4   : > { %331 = vst [vmem:[%s235_s24] sm:$0xff] %v329_v26 }
  0xb6   : > { %v325_v28 = vpop.f32.mrf.mxu2  ;;  %v301_v30 = vpop.f32.mrf.mxu0 }
  0xb7   : > { %v326_v29 = vadd.f32 %v325_v28, %v250_v27  ;;  %v314_v31 = vpop.f32.mrf.mxu1 }
  0xb9   : > { %v330_v32 = vpack.c.bf16 %v326_v29, %v326_v29 }
  0xbb   : > { %332 = vst [vmem:[%s235_s24 + $0x8] sm:$0xf] %v330_v32 }
  0xbc   : > { %705 = shalt.err (!%p702_p13)
}
  0xbd   : > { %513 = dma.vmem_to_hbm [thread:$0]  (%p864_p0), %s350_s25, 192, %s352_s26, %s334_s15  }
  0xbe   : > { %v327_v33 = vpop.f32.mrf.mxu2 }
  0xbf PF: > { %s363_s5 = sand.u32 1, %s744_s12   ;;  %p527_p2 = pnand %p458_p6, %p871_p5 }
  0xc0   : > { %s364_s9 = scalar_lea.sflag [#allocation4], %s363_s5 }
  0xc1   : > { %p528_p4 = pneg %p527_p2 }
  0xc3   : > { %739 = dma.done.wait (%p528_p4), %s364_s9, 192  }
  0xc4   : > { %741 = vsyncadd (%p528_p4), %s364_s9, 4294967104  ;;  %s20_s17 = sadd.s32 1, %s764_s17   ;;  %s944_s12 = smov %s748_s13 }
  0xc5   : > { %p17_p7 = scmp.ge.s32.totalorder %s20_s17, 4   ;;  %s945_s13 = smov %s752_s14 }
  0xc6   : > { %s946_s14 = smov %s869_s20  ;;  %s947_s15 = smov %s760_s16 }
  0xc7   : > { %s948_s16 = smov %s950_s6  ;;  %19 = sbr.rel (!%p17_p7) target bundleno = 7 (0x7), region = 85 }
  0xcc   :  { %370 = vsyncpa [#allocation3], 1 }
  0xcd   :  { %372 = vsyncpa [#allocation3 + $0x1], 1 }
  0xce   :  { %373 = vsyncpa [#allocation6], 1 }
  0xcf   :  { %374 = vsyncpa [#allocation4], 1 }
  0xd0   :  { %376 = vsyncpa [#allocation4 + $0x1], 1 }

</bundles_post_ra>
